<compile_context>
chip_gen: v7x
topology: tpu7x:2x2x1
jax: 0.10.0
libtpu: 0.0.40
codegen_flags: <defaults>
</compile_context>

<pallas_src>
import jax
import jax.numpy as jnp
from jax.experimental import pallas as pl
from jax.experimental.pallas import tpu as pltpu

_NEG_BIG = -1e30  # Python float: safe to close over inside kernels.


# ----------------------------------------------------------------------------
# Kernel 1: fused (current + momentum) projections + L2 normalize
# ----------------------------------------------------------------------------
def _proj_norm_kernel(img_ref, seq_ref, wi2_ref, bi2_ref, wt2_ref, bt2_ref,
                      img_out_ref, seq_out_ref):
    def project(x_ref, w_ref, b_ref, o_ref):
        n_rows, emb = o_ref.shape
        bsz = n_rows // 2
        # one (B, D) x (D, 2E) MXU matmul for current + momentum projections
        y = jnp.dot(x_ref[...], w_ref[...],
                    preferred_element_type=jnp.float32) + b_ref[...]
        y_cur, y_mom = y[:, :emb], y[:, emb:]
        # F.normalize(dim=-1): x / max(||x||, 1e-12) == x * rsqrt(max(||x||^2, 1e-24))
        inv_c = jax.lax.rsqrt(
            jnp.maximum(jnp.sum(y_cur * y_cur, -1, keepdims=True), 1e-24))
        inv_m = jax.lax.rsqrt(
            jnp.maximum(jnp.sum(y_mom * y_mom, -1, keepdims=True), 1e-24))
        o_ref[:bsz, :] = y_cur * inv_c
        o_ref[bsz:, :] = y_mom * inv_m

    project(img_ref, wi2_ref, bi2_ref, img_out_ref)
    project(seq_ref, wt2_ref, bt2_ref, seq_out_ref)


def proj_normalize_fused(img_cls, seq_cls, wi2, bi2, wt2, bt2):
    B = img_cls.shape[0]
    E = wi2.shape[1] // 2
    vmem = pl.BlockSpec(memory_space=pltpu.MemorySpace.VMEM)
    return pl.pallas_call(
        _proj_norm_kernel,
        out_shape=(jax.ShapeDtypeStruct((2 * B, E), jnp.float32),   # [fi ; fi_m]
                   jax.ShapeDtypeStruct((2 * B, E), jnp.float32)),  # [ft ; ft_m]
        in_specs=[vmem] * 6,
        out_specs=(vmem, vmem),
    )(img_cls, seq_cls, wi2, bi2, wt2, bt2)


# ----------------------------------------------------------------------------
# Kernel 2: ITC loss, tiled over the K = B + queue_size axis (online softmax)
# ----------------------------------------------------------------------------
def _make_itc_kernel(B, K_valid, tk):
    def kernel(scal_ref,                       # SMEM: [temp, alpha]
               fi_ref, ft_ref, txt_ref, img_ref,
               loss_ref, si2t_ref, st2i_ref,
               m_t, l_t, a_t, d_t, m_i, l_i, a_i, d_i):
        k = pl.program_id(0)
        temp = scal_ref[0]
        alpha = scal_ref[1]
        inv_t = 1.0 / temp

        @pl.when(k == 0)
        def _init():
            for m_ref in (m_t, m_i):
                m_ref[...] = jnp.full(m_ref.shape, _NEG_BIG, m_ref.dtype)
            for z_ref in (l_t, a_t, d_t, l_i, a_i, d_i):
                z_ref[...] = jnp.zeros(z_ref.shape, z_ref.dtype)

        col = jax.lax.broadcasted_iota(jnp.int32, (2 * B, tk), 1) + k * tk
        valid = col < K_valid                       # mask the zero-padded queue tail

        def accumulate(lhs_ref, rhs_ref, m_ref, l_ref, a_ref, d_ref, out_ref):
            # (2B, tk): rows [:B] = current sims, rows [B:] = momentum sims
            # bf16 operands, f32 accumulation on the MXU; contract on the last
            # dim of both operands (q @ k.T orientation, no explicit transpose).
            s = jax.lax.dot_general(
                lhs_ref[...], rhs_ref[...],
                dimension_numbers=(((1,), (1,)), ((), ())),
                preferred_element_type=jnp.float32) * inv_t
            s_msk = jnp.where(valid, s, _NEG_BIG)
            m_old = m_ref[...]
            m_new = jnp.maximum(m_old, jnp.max(s_msk, axis=-1, keepdims=True))
            corr = jnp.exp(m_old - m_new)
            p = jnp.exp(s_msk - m_new)              # 0 at padded columns
            l_ref[...] = l_ref[...] * corr + jnp.sum(p, axis=-1, keepdims=True)
            m_ref[...] = m_new
            s_cur = s[:B]                           # current-feature sims
            # A = sum_k s_cur * exp(s_mom - m_mom)  (soft-target numerator)
            a_ref[...] = a_ref[...] * corr[B:] + jnp.sum(
                s_cur * p[B:], axis=-1, keepdims=True)
            # diagonal of the current sims (the fill_diagonal_(1) hard target)
            row = jax.lax.broadcasted_iota(jnp.int32, (B, tk), 0)
            d_ref[...] += jnp.sum(jnp.where(row == col[:B], s_cur, 0.0),
                                  axis=-1, keepdims=True)
            out_ref[...] = s_cur                    # lane-dense (B, 128) store

        accumulate(fi_ref, txt_ref, m_t, l_t, a_t, d_t, si2t_ref)   # i2t side
        accumulate(ft_ref, img_ref, m_i, l_i, a_i, d_i, st2i_ref)   # t2i side

        @pl.when(k == pl.num_programs(0) - 1)
        def _finalize():
            def side_loss(m_ref, l_ref, a_ref, d_ref):
                lse = m_ref[:B, :] + jnp.log(l_ref[:B, :])          # logsumexp(sim)
                soft = a_ref[...] * pl.reciprocal(l_ref[B:, :], approx=True)
                row_loss = -(alpha * soft + (1.0 - alpha) * d_ref[...] - lse)
                return jnp.sum(row_loss) / B
            loss_ref[0, 0] = 0.5 * (side_loss(m_t, l_t, a_t, d_t) +
                                    side_loss(m_i, l_i, a_i, d_i))
    return kernel


def itc_loss(fi_stack, ft_stack, txt_all, img_all, temp, alpha, *, B, K_valid, tk):
    """fi_stack/ft_stack: (2B, E) bf16 rows [feat; feat_m].
    txt_all/img_all: (K_pad, E) bf16 rows [feat_m; queue; zero-pad]."""
    K_pad, E = txt_all.shape
    nk = K_pad // tk
    scal = jnp.stack([temp, alpha]).astype(jnp.float32)

    grid_spec = pltpu.PrefetchScalarGridSpec(
        num_scalar_prefetch=0,
        grid=(nk,),
        in_specs=[
            pl.BlockSpec(memory_space=pltpu.MemorySpace.SMEM),       # [temp, alpha]
            pl.BlockSpec((2 * B, E), lambda k: (0, 0)),
            pl.BlockSpec((2 * B, E), lambda k: (0, 0)),
            pl.BlockSpec((tk, E), lambda k: (k, 0)),
            pl.BlockSpec((tk, E), lambda k: (k, 0)),
        ],
        out_specs=(
            pl.BlockSpec(memory_space=pltpu.MemorySpace.SMEM),       # scalar loss
            pl.BlockSpec((B, tk), lambda k: (0, k)),                 # sim_i2t tiles
            pl.BlockSpec((B, tk), lambda k: (0, k)),                 # sim_t2i tiles
        ),
        scratch_shapes=[
            pltpu.VMEM((2 * B, 1), jnp.float32),   # m_t
            pltpu.VMEM((2 * B, 1), jnp.float32),   # l_t
            pltpu.VMEM((B, 1), jnp.float32),       # a_t
            pltpu.VMEM((B, 1), jnp.float32),       # d_t
            pltpu.VMEM((2 * B, 1), jnp.float32),   # m_i
            pltpu.VMEM((2 * B, 1), jnp.float32),   # l_i
            pltpu.VMEM((B, 1), jnp.float32),       # a_i
            pltpu.VMEM((B, 1), jnp.float32),       # d_i
        ],
    )
    return pl.pallas_call(
        _make_itc_kernel(B, K_valid, tk),
        out_shape=(jax.ShapeDtypeStruct((1, 1), jnp.float32),
                   jax.ShapeDtypeStruct((B, K_pad), jnp.float32),
                   jax.ShapeDtypeStruct((B, K_pad), jnp.float32)),
        grid_spec=grid_spec,
        # K axis carries accumulators -> "arbitrary".  On v7x keep the K tile
        # small enough for the 64 MiB VMEM (tk <= 2048 at production B/E).
        compiler_params=pltpu.CompilerParams(
            dimension_semantics=("arbitrary",),
            vmem_limit_bytes=64 * 1024 * 1024),
    )(scal, fi_stack, ft_stack, txt_all, img_all)


# ----------------------------------------------------------------------------
# Kernel 3: ITM head (padded to 128 lanes) + mean cross entropy
# ----------------------------------------------------------------------------
def _make_itm_kernel(B):
    def kernel(vl_ref, w_ref, b_ref, loss_ref, logits_ref):
        # bf16 operands, f32 accumulation; padded class biases are -1e30 so the
        # padded lanes vanish from the softmax.
        logits = jnp.dot(vl_ref[...], w_ref[...],
                         preferred_element_type=jnp.float32) + b_ref[...]
        m = jnp.max(logits, axis=-1, keepdims=True)
        sh = logits - m
        logp = sh - jnp.log(jnp.sum(jnp.exp(sh), axis=-1, keepdims=True))
        n, c = logits.shape
        row = jax.lax.broadcasted_iota(jnp.int32, (n, c), 0)
        col = jax.lax.broadcasted_iota(jnp.int32, (n, c), 1)
        labels = jnp.where(row < B, 1, 0)          # [1]*B + [0]*2B
        onehot = (col == labels).astype(jnp.float32)
        loss_ref[0, 0] = -jnp.sum(logp * onehot) / n
        logits_ref[...] = logits                    # lane-dense (3B, 128) store
    return kernel


def itm_head_loss(vl, w_pad, b_pad, B):
    n = vl.shape[0]
    c = w_pad.shape[1]
    vmem = pl.BlockSpec(memory_space=pltpu.MemorySpace.VMEM)
    smem = pl.BlockSpec(memory_space=pltpu.MemorySpace.SMEM)
    return pl.pallas_call(
        _make_itm_kernel(B),
        out_shape=(jax.ShapeDtypeStruct((1, 1), jnp.float32),
                   jax.ShapeDtypeStruct((n, c), jnp.float32)),
        in_specs=[vmem, vmem, vmem],
        out_specs=(smem, vmem),
    )(vl, w_pad, b_pad)


# ----------------------------------------------------------------------------
# Kernel 4: in-place queue enqueue (input_output_aliases + manual DMA)
# ----------------------------------------------------------------------------
def _queue_update_kernel(ptr_ref, new_i_ref, new_t_ref, iq_in_ref, tq_in_ref,
                         iq_out_ref, tq_out_ref, sem):
    del iq_in_ref, tq_in_ref       # aliased with the outputs; only B rows change
    ptr = ptr_ref[0]
    nb = new_i_ref.shape[0]
    cp_i = pltpu.make_async_copy(new_i_ref,
                                 iq_out_ref.at[pl.ds(ptr, nb), :], sem.at[0])
    cp_t = pltpu.make_async_copy(new_t_ref,
                                 tq_out_ref.at[pl.ds(ptr, nb), :], sem.at[1])
    cp_i.start()
    cp_t.start()
    cp_i.wait()
    cp_t.wait()


def queue_enqueue(ptr, new_img_rows, new_seq_rows, funcimg_queue, opseq_queue):
    q, e = funcimg_queue.shape
    vmem = pl.BlockSpec(memory_space=pltpu.MemorySpace.VMEM)
    smem = pl.BlockSpec(memory_space=pltpu.MemorySpace.SMEM)
    hbm = pl.BlockSpec(memory_space=pl.ANY)
    return pl.pallas_call(
        _queue_update_kernel,
        out_shape=(jax.ShapeDtypeStruct((q, e), jnp.float32),
                   jax.ShapeDtypeStruct((q, e), jnp.float32)),
        in_specs=[smem, vmem, vmem, hbm, hbm],
        out_specs=(hbm, hbm),
        scratch_shapes=[pltpu.SemaphoreType.DMA((2,))],
        input_output_aliases={3: 0, 4: 1},
    )(ptr, new_img_rows, new_seq_rows, funcimg_queue, opseq_queue)


# ----------------------------------------------------------------------------
# BlipPretrain.forward (cal_itc_itm_loss=True, cal_lm_loss=False)
# ----------------------------------------------------------------------------
def blip_pretrain_forward(params, buffers, samples, tk=128):
    funcimg_embeds = samples["funcimg_embeds"]   # (B, N_img, Dv)  encoder stand-in
    opseq_embeds = samples["opseq_embeds"]       # (B, N_seq, Dt)  encoder stand-in
    B = funcimg_embeds.shape[0]
    E = params["wi"].shape[1]

    # alpha ramp-up + temp clamp (scalar glue)
    nipe = samples["num_iters_per_epoch"]
    ramp = jnp.minimum(1.0, (samples["epoch"] * nipe + samples["iters"]) / (2.0 * nipe))
    alpha = params["alpha"] * ramp
    temp = jnp.clip(params["temp"], 0.001, 0.5)

    # momentum update of projection params (identical at init, kept for semantics)
    m = params["momentum"]
    wi_m = m * params["wi_m"] + (1 - m) * params["wi"]
    bi_m = m * params["bi_m"] + (1 - m) * params["bi"]
    wt_m = m * params["wt_m"] + (1 - m) * params["wt"]
    bt_m = m * params["bt_m"] + (1 - m) * params["bt"]

    img_cls = funcimg_embeds[:, 0, :]
    seq_cls = opseq_embeds[:, 0, :]

    # fused current+momentum projection weights: [w | w_m]
    wi2 = jnp.concatenate([params["wi"], wi_m], axis=1)
    bi2 = jnp.concatenate([params["bi"], bi_m], axis=0).reshape(1, 2 * E)
    wt2 = jnp.concatenate([params["wt"], wt_m], axis=1)
    bt2 = jnp.concatenate([params["bt"], bt_m], axis=0).reshape(1, 2 * E)

    # TODO(synk): momentum *encoders* are external modules; only the momentum
    # projections (owned by BlipPretrain) are reproduced here.
    img_stack, seq_stack = proj_normalize_fused(img_cls, seq_cls, wi2, bi2, wt2, bt2)
    funcimg_feat, funcimg_feat_m = img_stack[:B], img_stack[B:]
    opseq_feat, opseq_feat_m = seq_stack[:B], seq_stack[B:]

    # queues are stored row-major (Q, E) = transpose of the PyTorch (E, Q) buffer
    fq = buffers["funcimg_queue"]                # (Q, E)
    oq = buffers["opseq_queue"]                  # (Q, E)
    Q = fq.shape[0]
    K = B + Q
    K_pad = ((K + tk - 1) // tk) * tk            # lane-dense sim tiles

    def all_rows(feat_m, queue):                 # rows of (feat_all)^T, zero-padded
        rows = jnp.concatenate([feat_m, queue], axis=0)
        return jnp.pad(rows, ((0, K_pad - K), (0, 0))).astype(jnp.bfloat16)

    txt_all = all_rows(opseq_feat_m, oq)         # opseq_feat_all^T   (K_pad, E)
    img_all = all_rows(funcimg_feat_m, fq)       # funcimg_feat_all^T (K_pad, E)

    loss_itc, sim_i2t_pad, sim_t2i_pad = itc_loss(
        img_stack.astype(jnp.bfloat16), seq_stack.astype(jnp.bfloat16),
        txt_all, img_all, temp, alpha, B=B, K_valid=K, tk=tk)
    sim_i2t = sim_i2t_pad[:, :K]
    sim_t2i = sim_t2i_pad[:, :K]

    # _dequeue_and_enqueue: in-place aliased update of only the B new rows
    ptr_arr = jnp.full((1,), buffers["queue_ptr"], jnp.int32)
    funcimg_queue, opseq_queue = queue_enqueue(
        ptr_arr, funcimg_feat_m, opseq_feat_m, fq, oq)
    new_ptr = (buffers["queue_ptr"] + B) % Q

    # TODO(synk): output_pos / output_neg require the external multimodal BERT
    # encoder and torch.multinomial hard-negative sampling (get_same_ind); the
    # [3B, Dt] vl_embeddings (CLS states) are stood in deterministically here.
    pos_cls = opseq_embeds[:, 0, :]
    neg_a = jnp.roll(pos_cls, shift=1, axis=0)
    neg_b = jnp.roll(pos_cls, shift=-1, axis=0)
    vl_embeddings = jnp.concatenate([pos_cls, neg_a, neg_b], axis=0).astype(jnp.bfloat16)

    # ITM head padded to 128 lanes (zero weights, -1e30 biases on padded classes)
    C_pad = 128
    w_itm_pad = jnp.pad(params["w_itm"], ((0, 0), (0, C_pad - 2))).astype(jnp.bfloat16)
    b_itm_pad = jnp.concatenate(
        [params["b_itm"].astype(jnp.float32),
         jnp.full((C_pad - 2,), -1e30, jnp.float32)]).reshape(1, C_pad)

    loss_itm, itm_logits_pad = itm_head_loss(vl_embeddings, w_itm_pad, b_itm_pad, B)
    itm_logits = itm_logits_pad[:, :2]
    itm_labels = jnp.concatenate(
        [jnp.ones((B,), jnp.int32), jnp.zeros((2 * B,), jnp.int32)], axis=0)

    loss = loss_itc[0, 0] + loss_itm[0, 0]
    return {
        "loss": loss,
        "loss_itc": loss_itc[0, 0],
        "loss_itm": loss_itm[0, 0],
        "loss_lm": None,                          # cal_lm_loss=False
        "sim_i2t": sim_i2t,
        "sim_t2i": sim_t2i,
        "itm_logits": itm_logits,
        "itm_labels": itm_labels,
        "funcimg_queue": funcimg_queue,           # (Q, E) row-major storage
        "opseq_queue": opseq_queue,
        "queue_ptr": new_ptr,
    }


if __name__ == "__main__":
    key = jax.random.PRNGKey(0)
    B = 2                  # batch
    N_img, Dv = 5, 32      # funcimg tokens (CLS+patches), vision_width
    N_seq, Dt = 8, 32      # opseq tokens, hidden_size
    E = 16                 # embed_dim
    Q = 48                 # queue_size

    ks = jax.random.split(key, 10)

    # Stand-ins for the external ViT / BERT encoder outputs (last_hidden_state).
    funcimg_embeds = jax.random.normal(ks[0], (B, N_img, Dv), jnp.float32)
    opseq_embeds = jax.random.normal(ks[1], (B, N_seq, Dt), jnp.float32)

    # BlipPretrain-owned parameters (deterministic init).
    wi = 0.02 * jax.random.normal(ks[2], (Dv, E), jnp.float32)
    bi = jnp.zeros((E,), jnp.float32)
    wt = 0.02 * jax.random.normal(ks[3], (Dt, E), jnp.float32)
    bt = jnp.zeros((E,), jnp.float32)
    w_itm = 0.02 * jax.random.normal(ks[4], (Dt, 2), jnp.float32)
    b_itm = jnp.zeros((2,), jnp.float32)

    params = {
        "wi": wi, "bi": bi, "wt": wt, "bt": bt,
        "wi_m": wi, "bi_m": bi, "wt_m": wt, "bt_m": bt,   # copy_params()
        "w_itm": w_itm, "b_itm": b_itm,
        "temp": jnp.float32(0.07),
        "alpha": jnp.float32(0.4),
        "momentum": jnp.float32(0.995),
    }

    # Queues: randn(E, Q) normalized along dim 0 in PyTorch; stored here as the
    # row-major transpose (Q, E) with each row (= each queue entry) normalized.
    fq = jax.random.normal(ks[5], (Q, E), jnp.float32)
    oq = jax.random.normal(ks[6], (Q, E), jnp.float32)
    fq = fq / jnp.maximum(jnp.linalg.norm(fq, axis=1, keepdims=True), 1e-12)
    oq = oq / jnp.maximum(jnp.linalg.norm(oq, axis=1, keepdims=True), 1e-12)
    buffers = {"funcimg_queue": fq, "opseq_queue": oq, "queue_ptr": 0}

    samples = {
        "funcimg_embeds": funcimg_embeds,
        "opseq_embeds": opseq_embeds,
        "epoch": jnp.float32(0.0),
        "iters": jnp.float32(10.0),
        "num_iters_per_epoch": jnp.float32(100.0),
    }

    out = blip_pretrain_forward(params, buffers, samples)
    jax.block_until_ready(out["loss"])
    jax.block_until_ready(out["sim_i2t"])
    jax.block_until_ready(out["itm_logits"])
    jax.block_until_ready(out["funcimg_queue"])
    assert jnp.isfinite(out["loss"]), "loss is inf or nan"
    print("KERNEL_OK")
</pallas_src>

<mosaic_0001>
module attributes {stable_mosaic.version = 11 : i64} {
  func.func @_proj_norm_kernel(%arg0: memref<2x32xf32, #tpu.memory_space<vmem>>, %arg1: memref<2x32xf32, #tpu.memory_space<vmem>>, %arg2: memref<32x32xf32, #tpu.memory_space<vmem>>, %arg3: memref<1x32xf32, #tpu.memory_space<vmem>>, %arg4: memref<32x32xf32, #tpu.memory_space<vmem>>, %arg5: memref<1x32xf32, #tpu.memory_space<vmem>>, %arg6: memref<4x16xf32, #tpu.memory_space<vmem>>, %arg7: memref<4x16xf32, #tpu.memory_space<vmem>>) attributes {dimension_semantics = [], scalar_prefetch = 0 : i64, scratch_operands = 0 : i64, tpu.core_type = #tpu.core_type<tc>} {
    %c0 = arith.constant 0 : index
    %c0_0 = arith.constant 0 : index
    %0 = vector.load %arg0[%c0, %c0_0] : memref<2x32xf32, #tpu.memory_space<vmem>>, vector<2x32xf32>
    %c0_1 = arith.constant 0 : index
    %c0_2 = arith.constant 0 : index
    %1 = vector.load %arg2[%c0_1, %c0_2] : memref<32x32xf32, #tpu.memory_space<vmem>>, vector<32x32xf32>
    %cst = arith.constant dense<0.000000e+00> : vector<2x32xf32>
    %2 = tpu.matmul %0, %1, %cst {dimension_numbers = #tpu.dot_dimension_numbers<[1], [0], [0], [1], [0, 0, 1, 1], [], []>} : vector<2x32xf32>, vector<32x32xf32>, vector<2x32xf32> -> vector<2x32xf32>
    %c0_3 = arith.constant 0 : index
    %c0_4 = arith.constant 0 : index
    %3 = vector.load %arg3[%c0_3, %c0_4] : memref<1x32xf32, #tpu.memory_space<vmem>>, vector<1x32xf32>
    %4 = vector.broadcast %3 : vector<1x32xf32> to vector<2x32xf32>
    %5 = arith.addf %2, %4 : vector<2x32xf32>
    %6 = vector.extract_strided_slice %5 {offsets = [0, 0], sizes = [2, 16], strides = [1, 1]} : vector<2x32xf32> to vector<2x16xf32>
    %7 = vector.extract_strided_slice %5 {offsets = [0, 16], sizes = [2, 16], strides = [1, 1]} : vector<2x32xf32> to vector<2x16xf32>
    %8 = arith.mulf %6, %6 : vector<2x16xf32>
    %cst_5 = arith.constant dense<0.000000e+00> : vector<2xf32>
    %9 = vector.multi_reduction <add>, %8, %cst_5 [1] : vector<2x16xf32> to vector<2xf32>
    %10 = vector.shape_cast %9 : vector<2xf32> to vector<2x1xf32>
    %cst_6 = arith.constant 1.000000e-24 : f32
    %11 = vector.broadcast %cst_6 : f32 to vector<2x1xf32>
    %12 = arith.maximumf %10, %11 : vector<2x1xf32>
    %13 = math.rsqrt %12 : vector<2x1xf32>
    %14 = arith.mulf %7, %7 : vector<2x16xf32>
    %cst_7 = arith.constant dense<0.000000e+00> : vector<2xf32>
    %15 = vector.multi_reduction <add>, %14, %cst_7 [1] : vector<2x16xf32> to vector<2xf32>
    %16 = vector.shape_cast %15 : vector<2xf32> to vector<2x1xf32>
    %cst_8 = arith.constant 1.000000e-24 : f32
    %17 = vector.broadcast %cst_8 : f32 to vector<2x1xf32>
    %18 = arith.maximumf %16, %17 : vector<2x1xf32>
    %19 = math.rsqrt %18 : vector<2x1xf32>
    %20 = vector.broadcast %13 : vector<2x1xf32> to vector<2x16xf32>
    %21 = arith.mulf %6, %20 : vector<2x16xf32>
    %c0_9 = arith.constant 0 : index
    %c0_10 = arith.constant 0 : index
    %22 = vector.load %arg6[%c0_9, %c0_10] : memref<4x16xf32, #tpu.memory_space<vmem>>, vector<2x16xf32>
    tpu.vector_store %arg6[%c0_9, %c0_10], %21 {strides = array<i32>} : memref<4x16xf32, #tpu.memory_space<vmem>>, vector<2x16xf32>,
    %23 = vector.broadcast %19 : vector<2x1xf32> to vector<2x16xf32>
    %24 = arith.mulf %7, %23 : vector<2x16xf32>
    %c2 = arith.constant 2 : index
    %c0_11 = arith.constant 0 : index
    %25 = vector.load %arg6[%c2, %c0_11] : memref<4x16xf32, #tpu.memory_space<vmem>>, vector<2x16xf32>
    tpu.vector_store %arg6[%c2, %c0_11], %24 {strides = array<i32>} : memref<4x16xf32, #tpu.memory_space<vmem>>, vector<2x16xf32>,
    %c0_12 = arith.constant 0 : index
    %c0_13 = arith.constant 0 : index
    %26 = vector.load %arg1[%c0_12, %c0_13] : memref<2x32xf32, #tpu.memory_space<vmem>>, vector<2x32xf32>
    %c0_14 = arith.constant 0 : index
    %c0_15 = arith.constant 0 : index
    %27 = vector.load %arg4[%c0_14, %c0_15] : memref<32x32xf32, #tpu.memory_space<vmem>>, vector<32x32xf32>
    %cst_16 = arith.constant dense<0.000000e+00> : vector<2x32xf32>
    %28 = tpu.matmul %26, %27, %cst_16 {dimension_numbers = #tpu.dot_dimension_numbers<[1], [0], [0], [1], [0, 0, 1, 1], [], []>} : vector<2x32xf32>, vector<32x32xf32>, vector<2x32xf32> -> vector<2x32xf32>
    %c0_17 = arith.constant 0 : index
    %c0_18 = arith.constant 0 : index
    %29 = vector.load %arg5[%c0_17, %c0_18] : memref<1x32xf32, #tpu.memory_space<vmem>>, vector<1x32xf32>
    %30 = vector.broadcast %29 : vector<1x32xf32> to vector<2x32xf32>
    %31 = arith.addf %28, %30 : vector<2x32xf32>
    %32 = vector.extract_strided_slice %31 {offsets = [0, 0], sizes = [2, 16], strides = [1, 1]} : vector<2x32xf32> to vector<2x16xf32>
    %33 = vector.extract_strided_slice %31 {offsets = [0, 16], sizes = [2, 16], strides = [1, 1]} : vector<2x32xf32> to vector<2x16xf32>
    %34 = arith.mulf %32, %32 : vector<2x16xf32>
    %cst_19 = arith.constant dense<0.000000e+00> : vector<2xf32>
    %35 = vector.multi_reduction <add>, %34, %cst_19 [1] : vector<2x16xf32> to vector<2xf32>
    %36 = vector.shape_cast %35 : vector<2xf32> to vector<2x1xf32>
    %cst_20 = arith.constant 1.000000e-24 : f32
    %37 = vector.broadcast %cst_20 : f32 to vector<2x1xf32>
    %38 = arith.maximumf %36, %37 : vector<2x1xf32>
    %39 = math.rsqrt %38 : vector<2x1xf32>
    %40 = arith.mulf %33, %33 : vector<2x16xf32>
    %cst_21 = arith.constant dense<0.000000e+00> : vector<2xf32>
    %41 = vector.multi_reduction <add>, %40, %cst_21 [1] : vector<2x16xf32> to vector<2xf32>
    %42 = vector.shape_cast %41 : vector<2xf32> to vector<2x1xf32>
    %cst_22 = arith.constant 1.000000e-24 : f32
    %43 = vector.broadcast %cst_22 : f32 to vector<2x1xf32>
    %44 = arith.maximumf %42, %43 : vector<2x1xf32>
    %45 = math.rsqrt %44 : vector<2x1xf32>
    %46 = vector.broadcast %39 : vector<2x1xf32> to vector<2x16xf32>
    %47 = arith.mulf %32, %46 : vector<2x16xf32>
    %c0_23 = arith.constant 0 : index
    %c0_24 = arith.constant 0 : index
    %48 = vector.load %arg7[%c0_23, %c0_24] : memref<4x16xf32, #tpu.memory_space<vmem>>, vector<2x16xf32>
    tpu.vector_store %arg7[%c0_23, %c0_24], %47 {strides = array<i32>} : memref<4x16xf32, #tpu.memory_space<vmem>>, vector<2x16xf32>,
    %49 = vector.broadcast %45 : vector<2x1xf32> to vector<2x16xf32>
    %50 = arith.mulf %33, %49 : vector<2x16xf32>
    %c2_25 = arith.constant 2 : index
    %c0_26 = arith.constant 0 : index
    %51 = vector.load %arg7[%c2_25, %c0_26] : memref<4x16xf32, #tpu.memory_space<vmem>>, vector<2x16xf32>
    tpu.vector_store %arg7[%c2_25, %c0_26], %50 {strides = array<i32>} : memref<4x16xf32, #tpu.memory_space<vmem>>, vector<2x16xf32>,
    return
  }
}

</mosaic_0001>

<bundles_post_ra>
// kernel: tpu_custom_call.1
= control target key start
LH: loop header
LB: loop body
LE: loop exit
PB: predicated region body
PF: predicated region fallthrough
CT: control target
= control target key end

     0   :  { %13 = vsyncpa [#allocation3], 0  ;;  %s637_s0 = inlined_call_operand.hbm [shape: f32[2,32], index: 0, kind: input, shape index: {}]   ;;  %s638_s1 = inlined_call_operand.vmem [shape: f32[2,32], index: 1, kind: input, shape index: {}]   ;;  %s639_s2 = inlined_call_operand.hbm [shape: f32[32,32], index: 2, kind: input, shape index: {}]   ;;  %s640_s3 = inlined_call_operand.vmem [shape: f32[1,32], index: 3, kind: input, shape index: {}]   ;;  %s641_s4 = inlined_call_operand.hbm [shape: f32[32,32], index: 4, kind: input, shape index: {}]   ;;  %s642_s5 = inlined_call_operand.vmem [shape: f32[1,32], index: 5, kind: input, shape index: {}]   ;;  %s643_s6 = inlined_call_operand.hbm [shape: f32[4,16], index: 6, kind: output, shape index: {0}]   ;;  %s644_s7 = inlined_call_operand.hbm [shape: f32[4,16], index: 7, kind: output, shape index: {1}]  }
   0x1   :  { %14 = vsyncpa [#allocation6], 0 }
   0x2   :  { %15 = vsyncpa [#allocation4], 0 }
   0x3   :  { %16 = vsyncpa [#allocation10], 0  ;;  %s499_s24 = smov [#allocation5]   ;;  %s381_s28 = scalar_lea.hbm %s639_s2, 512 }
   0x4   :  { %s34_s25 = sshll.u32 %s499_s24, 4  ;;  %p382_p0 = scmp.ne.s32.totalorder %s639_s2, %s381_s28  ;;  %s35_s25 = int_to_ptr.vmem [resolvable:$true] %s34_s25 }
   0x5   :  { %p385_p1 = scmp.lt.u32.totalorder %s381_s28, %s639_s2 }
   0x7   :  { %p387_p2 = pnand %p385_p1, %p382_p0 }
   0x9   :  { %390 = shalt.err (!%p387_p2)
}
   0xa   :  { %s391_s10 = scalar_lea.vmem %s35_s25, 512  ;;  %p396_p4 = scmp.lt.s32.totalorder %s35_s25, %s35_s25 }
   0xb   :  { %p392_p3 = scmp.ne.s32.totalorder %s35_s25, %s391_s10  ;;  %p397_p5 = scmp.lt.s32.totalorder %s391_s10, %s391_s10 }
   0xd   :  { %p398_p6 = por %p397_p5, %p396_p4 }
   0xf   :  { %p399_p7 = pnand %p398_p6, %p392_p3 }
  0x11   :  { %402 = shalt.err (!%p399_p7)
}
  0x12   :  { %s500_s11 = smov 128   ;;  %s501_s12 = smov 8  }
  0x13   :  { %40 = dma.hbm_to_vmem [thread:$0]  %s639_s2, 512, %s35_s25, [#allocation6], %s500_s11, %s500_s11, %s501_s12  }
  0x14   :  { %s502_s15 = smov [#allocation2]   ;;  %s503_s17 = smov [#allocation7]  }
  0x15   :  { %s23_s16 = sshll.u32 %s502_s15, 4  ;;  %s48_s18 = sshll.u32 %s503_s17, 4  ;;  %s24_s16 = int_to_ptr.vmem [resolvable:$true] %s23_s16  ;;  %s49_s18 = int_to_ptr.vmem [resolvable:$true] %s48_s18 }
  0x16   :  { %s403_s21 = scalar_lea.hbm %s637_s0, 32 }
  0x17   :  { %p404_p8 = scmp.ne.s32.totalorder %s637_s0, %s403_s21  ;;  %p407_p9 = scmp.lt.u32.totalorder %s403_s21, %s637_s0 }
  0x19   :  { %p409_p10 = pnand %p407_p9, %p404_p8 }
  0x1b   :  { %412 = shalt.err (!%p409_p10)
}
  0x1c   :  { %s413_s2 = scalar_lea.vmem %s24_s16, 32  ;;  %p418_p12 = scmp.lt.s32.totalorder %s24_s16, %s24_s16 }
  0x1d   :  { %p414_p11 = scmp.ne.s32.totalorder %s24_s16, %s413_s2  ;;  %p419_p13 = scmp.lt.s32.totalorder %s413_s2, %s413_s2 }
  0x1f   :  { %p420_p0 = por %p419_p13, %p418_p12 }
  0x21   :  { %p421_p1 = pnand %p420_p0, %p414_p11 }
  0x23   :  { %424 = shalt.err (!%p421_p1)
}
  0x24   :  { %26 = dma.hbm_to_vmem [thread:$0]  %s637_s0, 32, %s24_s16, [#allocation3]  }
  0x25   :  { %s425_s30 = scalar_lea.hbm %s641_s4, 512 }
  0x26   :  { %p426_p2 = scmp.ne.s32.totalorder %s641_s4, %s425_s30  ;;  %p429_p3 = scmp.lt.u32.totalorder %s425_s30, %s641_s4 }
  0x28   :  { %p431_p4 = pnand %p429_p3, %p426_p2 }
  0x2a   :  { %434 = shalt.err (!%p431_p4)
}
  0x2b   :  { %s435_s14 = scalar_lea.vmem %s49_s18, 512  ;;  %p440_p6 = scmp.lt.s32.totalorder %s49_s18, %s49_s18 }
  0x2c   :  { %p436_p5 = scmp.ne.s32.totalorder %s49_s18, %s435_s14  ;;  %p441_p7 = scmp.lt.s32.totalorder %s435_s14, %s435_s14 }
  0x2e   :  { %p442_p8 = por %p441_p7, %p440_p6 }
  0x30   :  { %p443_p9 = pnand %p442_p8, %p436_p5 }
  0x32   :  { %446 = shalt.err (!%p443_p9)
}
  0x33   :  { %54 = dma.hbm_to_vmem [thread:$0]  %s641_s4, 512, %s49_s18, [#allocation6], %s500_s11, %s500_s11, %s501_s12  }
  0x34   :  { %491 = dma.done.wait [#allocation3], 32  }
  0x35   :  { %492 = vsyncadd [#allocation3], 4294967264 }
  0x36   :  { %493 = dma.done.wait [#allocation6], 1024  }
  0x37   :  { %494 = vsyncadd [#allocation6], 4294966272  ;;  %v504_v0 = vmov 0.0|0.0   ;;  %vm505_vm0 = vmmov 0   ;;  %v506_v1 = vmov 0.0   ;;  %v67_v2 = vld [vmem:[#allocation5] sm:$0xff] }
  0x38   :  { %350 = vmatprep.subr.bf16.mxu0 %v504_v0  ;;  %356 = vmatprep.subr.bf16.mxu1 %v504_v0  ;;  %v68_v3 = vld [vmem:[#allocation5 + $0x8] sm:$0xff]  ;;  %v177_v4 = vld [vmem:[#allocation7] sm:$0xff]  ;;  %v69_v7 = vld [vmem:[#allocation5 + $0x10] sm:$0xff]  ;;  %vm78_vm1 = vcmask 261120   ;;  %s507_s19 = smov 112   ;;  %vm153_vm2 = vcmask 123904  }
  0x39   :  { %336 = vmatprep.mubr.msk.f32.mxu0 %vm505_vm0, %v506_v1  ;;  %347 = vmatprep.mubr.msk.f32.mxu1 %vm505_vm0, %v506_v1  ;;  %v351_v5 = vpack.c.bf16 %v68_v3, %v67_v2  ;;  %v178_v6 = vld [vmem:[#allocation7 + $0x8] sm:$0xff]  ;;  %v70_v8 = vld [vmem:[#allocation5 + $0x18] sm:$0xff]  ;;  %v179_v10 = vld [vmem:[#allocation7 + $0x10] sm:$0xff] }
  0x3a   :  { %v357_v9 = vpack.c.bf16 %v178_v6, %v177_v4  ;;  %v180_v11 = vld [vmem:[#allocation7 + $0x18] sm:$0xff]  ;;  %v354_v12 = vpack.c.bf16 %v70_v8, %v69_v7 }
  0x3b   :  { %352 = vmatpush3.bf16.msra.mxu0 %v351_v5  ;;  %v360_v13 = vpack.c.bf16 %v180_v11, %v179_v10  ;;  %v66_v14 = vld [vmem:[#allocation2] sm:$0x3] }
  0x3c   :  { %353 = vmatprep.subr.bf16.mxu0 %v504_v0  ;;  %358 = vmatpush3.bf16.msra.mxu1 %v357_v9  ;;  %v176_v15 = vld [vmem:[%s638_s1] sm:$0x3]  ;;  %s508_s1 = smov [#allocation8]  }
  0x3d   :  { %359 = vmatprep.subr.bf16.mxu1 %v504_v0  ;;  %v314_v16 = vld [vmem:[%s640_s3] ss:$0 sm:$0xff]  ;;  %s290_s3 = sshll.u32 %s508_s1, 4  ;;  %s291_s3 = int_to_ptr.vmem [resolvable:$true] %s290_s3 }
  0x3e   :  { %v316_v17 = vld [vmem:[%s642_s5] ss:$0 sm:$0xff]  ;;  %s509_s5 = smov [#allocation9]   ;;  %s447_s21 = scalar_lea.vmem %s291_s3, 64 }
  0x3f   :  { %355 = vmatpush3.bf16.msra.mxu0 %v354_v12  ;;  %s300_s20 = sshll.u32 %s509_s5, 4  ;;  %p448_p10 = scmp.ne.s32.totalorder %s291_s3, %s447_s21  ;;  %s301_s20 = int_to_ptr.vmem [resolvable:$true] %s300_s20 }
  0x40   :  { %361 = vmatpush3.bf16.msra.mxu1 %v360_v13  ;;  %p452_p11 = scmp.lt.s32.totalorder %s291_s3, %s291_s3  ;;  %p453_p12 = scmp.lt.s32.totalorder %s447_s21, %s447_s21 }
  0x42   :  { %337 = vmatmul.mubr.msk.f32.vlgmr.msra.gmra.mrb[0].mxu0 %vm78_vm1, %v66_v14  ;;  %p454_p13 = por %p453_p12, %p452_p11 }
  0x43   :  { %348 = vmatmul.mubr.msk.f32.vlgmr.msra.gmra.mrb[0].mxu1 %vm78_vm1, %v176_v15 }
  0x44   :  { %p455_p0 = pnand %p454_p13, %p448_p10 }
 0x115   :  { %v148_v18 = vpop.f32.mrb[0].mxu0 }
 0x116   :  { %v149_v19 = vadd.f32 %v314_v16, %v148_v18  ;;  %v338_v20 = vpop.f32.mrb[1].mxu0  ;;  %v257_v21 = vpop.f32.mrb[0].mxu1 }
 0x117   :  { %v258_v22 = vadd.f32 %v316_v17, %v257_v21  ;;  %v349_v23 = vpop.f32.mrb[1].mxu1 }
 0x118   :  { %v152_v24 = vmul.f32 %v149_v19, %v149_v19 }
 0x119   :  { %v261_v25 = vmul.f32 %v258_v22, %v258_v22 }
 0x11a   :  { %160 = vrot.lane.b32.xlu0 %v152_v24, %s507_s19  ;;  %v154_v26 = vsel %vm153_vm2, %v152_v24, 0.0 }
 0x11b   :  { %v262_v31 = vsel %vm153_vm2, %v261_v25, 0.0 }
 0x11e   :  { %268 = vrot.lane.b32.xlu0 %v261_v25, %s507_s19 }
 0x13d   :  { %155 = vadd.xlane.f32.xlu0 %v154_v26 }
 0x18c   :  { %v161_v27 = vpop.permute.xlu0 %160 }
 0x18d   :  { %v163_v28 = vsel %vm153_vm2, %v161_v27, 0.0 }
 0x18e   :  { %164 = vadd.xlane.f32.xlu1 %v163_v28 }
 0x190   :  { %v269_v29 = vpop.permute.xlu0 %268 }
 0x191   :  { %v271_v30 = vsel %vm153_vm2, %v269_v29, 0.0 }
 0x192   :  { %272 = vadd.xlane.f32.xlu1 %v271_v30 }
 0x196   :  { %263 = vadd.xlane.f32.xlu1 %v262_v31 }
 0x1ca   :  { %v156_v32 = vpop.xlane.xlu0 %155 }
 0x1cb   :  { %v157_v33 = vmax.f32 %v156_v32, 1e-24 }
 0x1cd   :  { %373 = vrsqrt.f32 %v157_v33 }
 0x1d7   :  { %v374_v34 = vpop.eup %373 }
 0x1d8   :  { %v168_v35 = vmul.f32 %v374_v34, %v149_v19 }
 0x1da   :  { %169 = vst.msk [vmem:[#allocation8] sm:$0x3] %vm153_vm2, %v168_v35 }
 0x21b   :  { %v165_v36 = vpop.xlane.xlu1 %164 }
 0x21c   :  { %v166_v37 = vmax.f32 %v165_v36, 1e-24 }
 0x21e   :  { %375 = vrsqrt.f32 %v166_v37 }
 0x21f   :  { %v273_v38 = vpop.xlane.xlu1 %272 }
 0x220   :  { %v274_v39 = vmax.f32 %v273_v38, 1e-24 }
 0x222   :  { %377 = vrsqrt.f32 %v274_v39 }
 0x223   :  { %v264_v40 = vpop.xlane.xlu1 %263 }
 0x224   :  { %v265_v41 = vmax.f32 %v264_v40, 1e-24 }
 0x226   :  { %379 = vrsqrt.f32 %v265_v41 }
 0x228   :  { %v376_v42 = vpop.eup %375 }
 0x229   :  { %v170_v43 = vmul.f32 %v376_v42, %v149_v19 }
 0x22b   :  { %172 = vrot.lane.b32.xlu1 %v170_v43, %s507_s19 }
 0x22c   :  { %v378_v44 = vpop.eup %377 }
 0x22d   :  { %v278_v45 = vmul.f32 %v378_v44, %v258_v22 }
 0x22f   :  { %280 = vrot.lane.b32.xlu1 %v278_v45, %s507_s19 }
 0x230   :  { %v380_v46 = vpop.eup %379 }
 0x231   :  { %v276_v47 = vmul.f32 %v380_v46, %v258_v22 }
 0x233   :  { %277 = vst.msk [vmem:[#allocation9] sm:$0x3] %vm153_vm2, %v276_v47 }
 0x29d   :  { %v173_v48 = vpop.permute.xlu1 %172 }
 0x29e   :  { %175 = vst.msk [vmem:[#allocation8 + $0x2] sm:$0x3] %vm153_vm2, %v173_v48 }
 0x29f   :  { %458 = shalt.err (!%p455_p0)
}
 0x2a0   :  { %s459_s24 = scalar_lea.hbm %s643_s6, 64 }
 0x2a1   :  { %p460_p1 = scmp.ne.s32.totalorder %s643_s6, %s459_s24  ;;  %p463_p2 = scmp.lt.u32.totalorder %s459_s24, %s643_s6 }
 0x2a3   :  { %p465_p3 = pnand %p463_p2, %p460_p1 }
 0x2a5   :  { %468 = shalt.err (!%p465_p3)
}
 0x2a6   :  { %293 = dma.vmem_to_hbm [thread:$0]  %s291_s3, 64, %s643_s6, [#allocation4]   ;;  %v281_v49 = vpop.permute.xlu1 %280 }
 0x2a7   :  { %283 = vst.msk [vmem:[#allocation9 + $0x2] sm:$0x3] %vm153_vm2, %v281_v49  ;;  %s469_s30 = scalar_lea.vmem %s301_s20, 64  ;;  %p474_p5 = scmp.lt.s32.totalorder %s301_s20, %s301_s20 }
 0x2a8   :  { %p470_p4 = scmp.ne.s32.totalorder %s301_s20, %s469_s30  ;;  %p475_p6 = scmp.lt.s32.totalorder %s469_s30, %s469_s30 }
 0x2aa   :  { %p476_p7 = por %p475_p6, %p474_p5 }
 0x2ac   :  { %p477_p8 = pnand %p476_p7, %p470_p4 }
 0x2ae   :  { %480 = shalt.err (!%p477_p8)
}
 0x2af   :  { %s481_s10 = scalar_lea.hbm %s644_s7, 64 }
 0x2b0   :  { %p482_p9 = scmp.ne.s32.totalorder %s644_s7, %s481_s10  ;;  %p485_p10 = scmp.lt.u32.totalorder %s481_s10, %s644_s7 }
 0x2b2   :  { %p487_p11 = pnand %p485_p10, %p482_p9 }
 0x2b4   :  { %490 = shalt.err (!%p487_p11)
}
 0x2b5   :  { %303 = dma.vmem_to_hbm [thread:$0]  %s301_s20, 64, %s644_s7, [#allocation10]  }
 0x2b6   :  { %495 = dma.done.wait [#allocation4], 64  }
 0x2b7   :  { %496 = vsyncadd [#allocation4], 4294967232 }
 0x2b8   :  { %497 = dma.done.wait [#allocation10], 64  }
 0x2b9   :  { %498 = vsyncadd [#allocation10], 4294967232 }
 0x2ba   :  { %310 = vsyncpa [#allocation3], 1 }
 0x2bb   :  { %311 = vsyncpa [#allocation6], 1 }
 0x2bc   :  { %312 = vsyncpa [#allocation4], 1 }
 0x2bd   :  { %313 = vsyncpa [#allocation10], 1 }

</bundles_post_ra>
